<compile_context>
chip_gen: v7x
topology: tpu7x:2x2x1
jax: 0.10.0
libtpu: 0.0.40
codegen_flags: <defaults>
</compile_context>

<pallas_src>
import functools

import jax
import jax.numpy as jnp
from jax.experimental import pallas as pl
from jax.experimental.pallas import tpu as pltpu

_PACK = 128  # packed output row width (one full lane row -> unmasked vst)


def attention_kernel(x_ref, w1_ref, b1_ref, w2_ref, out_ref, *, seq, hidden):
    x = x_ref[0]                                        # (S, H) f32

    # linear1 + tanh: bf16 MXU operands, f32 accumulate, f32 elementwise.
    h = jnp.dot(
        x.astype(jnp.bfloat16),
        w1_ref[...].astype(jnp.bfloat16),
        preferred_element_type=jnp.float32,
    ) + b1_ref[...]                                     # (S, H)
    t = jnp.tanh(h)

    # linear2 -> one score per position, laid out on the LANE axis: (1, S).
    # (Contraction over the last dim of both operands, q @ k^T style.)
    # linear2 bias omitted: it is exactly cancelled by the softmax below.
    s = jnp.einsum("oh,sh->os", w2_ref[...], t,
                   preferred_element_type=jnp.float32)  # (1, S)

    # Numerically-stable softmax over the sequence (lane reductions).
    e = jnp.exp(s - jnp.max(s, axis=-1, keepdims=True))
    w = e / jnp.sum(e, axis=-1, keepdims=True)          # (1, S)

    # Attention context: (1, S) @ (S, H) -> (1, H) on the MXU.
    ctx = jnp.dot(
        w.astype(jnp.bfloat16),
        x.astype(jnp.bfloat16),
        preferred_element_type=jnp.float32,
    )                                                   # (1, H)

    # Pack [ctx | weights | zero pad] into one lane-dense 128-wide row and do
    # a single full-lane store (single writeback DMA for both results).
    pad = _PACK - hidden - seq
    out_ref[0] = jnp.concatenate(
        [ctx, w, jnp.zeros((1, pad), jnp.float32)], axis=-1
    )


def attention_forward(inputs, params):
    """inputs: (B, S, H) f32.  Returns (attn_outputs (B, H), attn_weights (B, S))."""
    b, s, h = inputs.shape
    assert h + s <= _PACK, "packed output row would overflow 128 lanes"

    kernel = functools.partial(attention_kernel, seq=s, hidden=h)

    packed = pl.pallas_call(
        kernel,
        out_shape=jax.ShapeDtypeStruct((b, 1, _PACK), jnp.float32),
        grid=(b,),
        in_specs=[
            pl.BlockSpec((1, s, h), lambda i: (i, 0, 0)),   # inputs (per batch row)
            pl.BlockSpec((h, h), lambda i: (0, 0)),         # W1 (in, out), resident
            pl.BlockSpec((1, h), lambda i: (0, 0)),         # b1
            pl.BlockSpec((1, h), lambda i: (0, 0)),         # W2 row (torch shape (1, H))
        ],
        out_specs=pl.BlockSpec((1, 1, _PACK), lambda i: (i, 0, 0)),
        compiler_params=pltpu.CompilerParams(
            dimension_semantics=("parallel",),  # batch rows are independent
        ),
    )(inputs, params["w1"], params["b1"], params["w2"])

    packed = packed.reshape(b, _PACK)
    attn_outputs = packed[:, :h]
    attn_weights = packed[:, h:h + s]
    return attn_outputs, attn_weights


def attention_reference(inputs, params):
    """Pure-JAX f32 reference matching the PyTorch forward (incl. linear2 bias)."""
    t = jnp.tanh(jnp.einsum("bsh,hk->bsk", inputs, params["w1"]) + params["b1"])
    scores = jnp.einsum("bsk,k->bs", t, params["w2"][0]) + params["b2"]
    e = jnp.exp(scores - jnp.max(scores, axis=1, keepdims=True))
    w = e / jnp.sum(e, axis=1, keepdims=True)
    out = jnp.einsum("bs,bsh->bh", w, inputs)
    return out, w


def make_params(key, hidden):
    """PyTorch nn.Linear default init.  w1 stored as (in, out) (transposed)."""
    k1, k2, k3, k4 = jax.random.split(key, 4)
    bound = 1.0 / (hidden ** 0.5)
    return {
        "w1": jax.random.uniform(k1, (hidden, hidden), jnp.float32, -bound, bound),
        "b1": jax.random.uniform(k2, (1, hidden), jnp.float32, -bound, bound),
        "w2": jax.random.uniform(k3, (1, hidden), jnp.float32, -bound, bound),
        "b2": jax.random.uniform(k4, (), jnp.float32, -bound, bound),
    }


if __name__ == "__main__":
    B, S, H = 2, 8, 32

    key = jax.random.PRNGKey(0)
    k_x, k_p = jax.random.split(key)
    x = jax.random.normal(k_x, (B, S, H), dtype=jnp.float32)
    params = make_params(k_p, H)

    attn_out, attn_w = attention_forward(x, params)
    jax.block_until_ready((attn_out, attn_w))

    assert attn_out.shape == (B, H)
    assert attn_w.shape == (B, S)
    assert bool(jnp.allclose(jnp.sum(attn_w, axis=-1), 1.0, atol=1e-4))

    # Loose-tolerance check vs the f32 reference (kernel uses bf16 MXU operands).
    ref_out, ref_w = attention_reference(x, params)
    assert bool(jnp.allclose(attn_w, ref_w, atol=2e-2, rtol=5e-2))
    assert bool(jnp.allclose(attn_out, ref_out, atol=5e-2, rtol=5e-2))

    print("KERNEL_OK")
</pallas_src>

<mosaic_0001>
module attributes {stable_mosaic.version = 11 : i64} {
  func.func @attention_kernel(%arg0: i32, %arg1: memref<1x8x32xf32, #tpu.memory_space<vmem>>, %arg2: memref<32x32xf32, #tpu.memory_space<vmem>>, %arg3: memref<1x32xf32, #tpu.memory_space<vmem>>, %arg4: memref<1x32xf32, #tpu.memory_space<vmem>>, %arg5: memref<1x1x128xf32, #tpu.memory_space<vmem>>) attributes {dimension_semantics = [#tpu.dimension_semantics<parallel>], iteration_bounds = array<i64: 2>, scalar_prefetch = 0 : i64, scratch_operands = 0 : i64, tpu.core_type = #tpu.core_type<tc>, window_params = [{transform_indices = @transform_0, window_bounds = array<i64: 1, 8, 32>}, {pipeline_mode = #tpu.pipeline_mode<synchronous>, transform_indices = @transform_1, window_bounds = array<i64: 32, 32>}, {pipeline_mode = #tpu.pipeline_mode<synchronous>, transform_indices = @transform_2, window_bounds = array<i64: 1, 32>}, {pipeline_mode = #tpu.pipeline_mode<synchronous>, transform_indices = @transform_3, window_bounds = array<i64: 1, 32>}, {transform_indices = @transform_4, window_bounds = array<i64: 1, 1, 128>}]} {
    %c0 = arith.constant 0 : index
    %c0_0 = arith.constant 0 : index
    %c0_1 = arith.constant 0 : index
    %0 = vector.load %arg1[%c0, %c0_0, %c0_1] : memref<1x8x32xf32, #tpu.memory_space<vmem>>, vector<1x8x32xf32>
    %1 = vector.shape_cast %0 : vector<1x8x32xf32> to vector<8x32xf32>
    %2 = arith.truncf %1 : vector<8x32xf32> to vector<8x32xbf16>
    %c0_2 = arith.constant 0 : index
    %c0_3 = arith.constant 0 : index
    %3 = vector.load %arg2[%c0_2, %c0_3] : memref<32x32xf32, #tpu.memory_space<vmem>>, vector<32x32xf32>
    %4 = arith.truncf %3 : vector<32x32xf32> to vector<32x32xbf16>
    %cst = arith.constant dense<0.000000e+00> : vector<8x32xf32>
    %5 = tpu.matmul %2, %4, %cst {dimension_numbers = #tpu.dot_dimension_numbers<[1], [0], [0], [1], [0, 0, 1, 1], [], []>} : vector<8x32xbf16>, vector<32x32xbf16>, vector<8x32xf32> -> vector<8x32xf32>
    %c0_4 = arith.constant 0 : index
    %c0_5 = arith.constant 0 : index
    %6 = vector.load %arg3[%c0_4, %c0_5] : memref<1x32xf32, #tpu.memory_space<vmem>>, vector<1x32xf32>
    %7 = vector.broadcast %6 : vector<1x32xf32> to vector<8x32xf32>
    %8 = arith.addf %5, %7 : vector<8x32xf32>
    %9 = math.tanh %8 : vector<8x32xf32>
    %c0_6 = arith.constant 0 : index
    %c0_7 = arith.constant 0 : index
    %10 = vector.load %arg4[%c0_6, %c0_7] : memref<1x32xf32, #tpu.memory_space<vmem>>, vector<1x32xf32>
    "tpu.trace_start"() <{level = 10 : i32, message = "oh,sh->os"}> : () -> ()
    %cst_8 = arith.constant dense<0.000000e+00> : vector<1x8xf32>
    %11 = tpu.matmul %10, %9, %cst_8 {dimension_numbers = #tpu.dot_dimension_numbers<[1], [1], [0], [0], [0, 0, 1, 0], [], []>} : vector<1x32xf32>, vector<8x32xf32>, vector<1x8xf32> -> vector<1x8xf32>
    "tpu.trace_stop"() : () -> ()
    %cst_9 = arith.constant dense<0xFF800000> : vector<1xf32>
    %12 = vector.multi_reduction <maximumf>, %11, %cst_9 [1] : vector<1x8xf32> to vector<1xf32>
    %13 = vector.shape_cast %12 : vector<1xf32> to vector<1x1xf32>
    %14 = vector.broadcast %13 : vector<1x1xf32> to vector<1x8xf32>
    %15 = arith.subf %11, %14 : vector<1x8xf32>
    %16 = math.exp %15 : vector<1x8xf32>
    %cst_10 = arith.constant dense<0.000000e+00> : vector<1xf32>
    %17 = vector.multi_reduction <add>, %16, %cst_10 [1] : vector<1x8xf32> to vector<1xf32>
    %18 = vector.shape_cast %17 : vector<1xf32> to vector<1x1xf32>
    %19 = vector.broadcast %18 : vector<1x1xf32> to vector<1x8xf32>
    %20 = arith.divf %16, %19 : vector<1x8xf32>
    %21 = arith.truncf %20 : vector<1x8xf32> to vector<1x8xbf16>
    %22 = arith.truncf %1 : vector<8x32xf32> to vector<8x32xbf16>
    %cst_11 = arith.constant dense<0.000000e+00> : vector<1x32xf32>
    %23 = tpu.matmul %21, %22, %cst_11 {dimension_numbers = #tpu.dot_dimension_numbers<[1], [0], [0], [1], [0, 0, 1, 1], [], []>} : vector<1x8xbf16>, vector<8x32xbf16>, vector<1x32xf32> -> vector<1x32xf32>
    %cst_12 = arith.constant 0.000000e+00 : f32
    %24 = vector.broadcast %cst_12 : f32 to vector<1x88xf32>
    %25 = tpu.concatenate %23, %20, %24 in 1 : vector<1x32xf32>, vector<1x8xf32>, vector<1x88xf32> -> vector<1x128xf32>
    %c0_13 = arith.constant 0 : index
    %c0_14 = arith.constant 0 : index
    %c0_15 = arith.constant 0 : index
    %26 = vector.load %arg5[%c0_13, %c0_14, %c0_15] : memref<1x1x128xf32, #tpu.memory_space<vmem>>, vector<1x1x128xf32>
    %27 = vector.shape_cast %26 : vector<1x1x128xf32> to vector<1x128xf32>
    %28 = vector.shape_cast %25 : vector<1x128xf32> to vector<1x1x128xf32>
    tpu.vector_store %arg5[%c0_13, %c0_14, %c0_15], %28 {strides = array<i32>} : memref<1x1x128xf32, #tpu.memory_space<vmem>>, vector<1x1x128xf32>,
    return
  }
  func.func @transform_0(%arg0: i32) -> (i32, i32, i32) {
    %c0_i32 = arith.constant 0 : i32
    %c0_i32_0 = arith.constant 0 : i32
    %c0_i32_1 = arith.constant 0 : i32
    return %arg0, %c0_i32, %c0_i32_0 : i32, i32, i32
  }
  func.func @transform_1(%arg0: i32) -> (i32, i32) {
    %c0_i32 = arith.constant 0 : i32
    %c0_i32_0 = arith.constant 0 : i32
    %c0_i32_1 = arith.constant 0 : i32
    return %c0_i32, %c0_i32_0 : i32, i32
  }
  func.func @transform_2(%arg0: i32) -> (i32, i32) {
    %c0_i32 = arith.constant 0 : i32
    %c0_i32_0 = arith.constant 0 : i32
    %c0_i32_1 = arith.constant 0 : i32
    return %c0_i32, %c0_i32_0 : i32, i32
  }
  func.func @transform_3(%arg0: i32) -> (i32, i32) {
    %c0_i32 = arith.constant 0 : i32
    %c0_i32_0 = arith.constant 0 : i32
    %c0_i32_1 = arith.constant 0 : i32
    return %c0_i32, %c0_i32_0 : i32, i32
  }
  func.func @transform_4(%arg0: i32) -> (i32, i32, i32) {
    %c0_i32 = arith.constant 0 : i32
    %c0_i32_0 = arith.constant 0 : i32
    %c0_i32_1 = arith.constant 0 : i32
    return %arg0, %c0_i32, %c0_i32_0 : i32, i32, i32
  }
}

</mosaic_0001>

<bundles_post_ra>
// kernel: tpu_custom_call.1
= control target key start
LH: loop header
LB: loop body
LE: loop exit
PB: predicated region body
PF: predicated region fallthrough
CT: control target
= control target key end

     0   :  { %9 = vsyncpa [#allocation3], 0  ;;  %s1006_s0 = inlined_call_operand.hbm [shape: f32[2,8,32], index: 0, kind: input, shape index: {}]   ;;  %s1007_s1 = inlined_call_operand.hbm [shape: f32[32,32], index: 1, kind: input, shape index: {}]   ;;  %s1008_s2 = inlined_call_operand.vmem [shape: f32[1,32], index: 2, kind: input, shape index: {}]   ;;  %s1009_s3 = inlined_call_operand.vmem [shape: f32[1,32], index: 3, kind: input, shape index: {}]   ;;  %s1010_s4 = inlined_call_operand.hbm [shape: f32[2,1,128], index: 4, kind: output, shape index: {}]  }
   0x1   :  { %11 = vsyncpa [#allocation3 + $0x1], 0 }
   0x2   :  { %12 = vsyncpa [#allocation6], 0 }
   0x3   :  { %13 = vsyncpa [#allocation4], 0 }
   0x4   :  { %15 = vsyncpa [#allocation4 + $0x1], 0  ;;  %s796_s15 = smov 0   ;;  %s798_s16 = smov 0  }
   0x5   :  { %s800_s17 = smov 0   ;;  %s802_s18 = smov 0  }
   0x6 LB: > { %s817_s19 = sadd.s32 4294967295, %s761_s18   ;;  %s522_s20 = sadd.s32 4294967294, %s761_s18   ;;  %s761_s18 = sphi %s802_s18, %s1030_s18   ;;  %s757_s17 = sphi %s800_s17, %s1029_s17   ;;  %s753_s16 = sphi %s798_s16, %s1028_s16   ;;  %s749_s15 = sphi %s796_s15, %s1027_s15  }
   0x7   : > { %p41_p0 = scmp.ne.s32.totalorder %s753_s16, %s749_s15  ;;  %p1011_p1 = scmp.eq.s32.totalorder %s817_s19, 0 }
   0x8   : > { %p134_p3 = scmp.eq.s32.totalorder %s522_s20, 1  ;;  %p523_p5 = scmp.ge.s32.totalorder %s761_s18, 1 }
   0x9   : > { %p826_p4 = por %p1011_p1, %p41_p0  ;;  %p141_p7 = scmp.lt.s32.totalorder %s761_s18, 3 }
   0xa   : > { %p831_p6 = por %p134_p3, %p41_p0  ;;  %s763_s24 = smov [#allocation5]  }
   0xb   : > { %s1014_s21 = scalar_select %p826_p4, 1, 0 }
   0xc   : > { %s1015_s22 = scalar_select %p831_p6, 1, 0 }
   0xd   : > { %p836_p8 = pnand %p523_p5, %p141_p7  ;;  %s153_s25 = sshll.u32 %s763_s24, 4  ;;  %s840_s25 = int_to_ptr.vmem [resolvable:$true] %s153_s25 }
   0xe   : > { %s852_s27 = sadd.s32 1, %s761_s18   ;;  %s28_s28 = sadd.s32 1, %s757_s17 }
   0xf   : > { %s1016_s23 = scalar_select %p836_p8, 1, 0 }
  0x10   : > { %p573_p9 = pneg %p836_p8  ;;  %s25_s29 = ssub.s32 %s761_s18, %s852_s27 }
  0x11   : > { %s633_s6 = scalar_lea.hbm %s1007_s1, 512 }
  0x12   : > { %p847_p11 = pnand %p573_p9, %p1011_p1  ;;  %p634_p12 = scmp.ne.s32.totalorder %s1007_s1, %s633_s6 }
  0x13   : > { %p640_p5 = scmp.lt.u32.totalorder %s633_s6, %s1007_s1 }
  0x14   : > { %p635_p13 = pneg %p847_p11 }
  0x16   : > { %p636_p0 = pnand %p635_p13, %p634_p12 }
  0x18   : > { %p637_p3 = pneg %p636_p0 }
  0x1a   : > { %p642_p7 = pnand %p640_p5, %p637_p3 }
  0x1c   : > { %645 = shalt.err (!%p642_p7)
}
  0x1d   : > { %s646_s11 = scalar_lea.vmem %s840_s25, 512  ;;  %p654_p2 = scmp.lt.s32.totalorder %s840_s25, %s840_s25 }
  0x1e   : > { %p647_p9 = scmp.ne.s32.totalorder %s840_s25, %s646_s11  ;;  %p655_p6 = scmp.lt.s32.totalorder %s646_s11, %s646_s11 }
  0x20   : > { %p649_p10 = pnand %p647_p9, %p635_p13  ;;  %p656_p4 = por %p655_p6, %p654_p2 }
  0x22   : > { %p650_p1 = pneg %p649_p10 }
  0x24   : > { %p657_p8 = pnand %p656_p4, %p650_p1 }
  0x26   : > { %660 = shalt.err (!%p657_p8)
}
  0x27   : > { %s764_s12 = smov 128   ;;  %s765_s13 = smov 8  }
  0x28   : > { %576 = dma.hbm_to_vmem [thread:$0]  (!%p847_p11), %s1007_s1, 512, %s840_s25, [#allocation6], %s764_s12, %s764_s12, %s765_s13  }
  0x29   : > { %p26_p2 = scmp.eq.s32.totalorder %s25_s29, 0  ;;  %p35_p1 = scmp.ne.s32.totalorder %s757_s17, %s753_s16 }
  0x2a   : > { %p36_p4 = scmp.eq.s32.totalorder %s761_s18, 0  ;;  %p586_p6 = scmp.lt.s32.totalorder %s761_s18, 2 }
  0x2b   : > { %s883_s24 = scalar_select %p26_p2, %s757_s17, %s28_s28  }
  0x2c   : > { %p37_p8 = por %p36_p4, %p35_p1  ;;  %p1018_p10 = scmp.eq.s32.totalorder %s817_s19, 1 }
  0x2d   : > { %s173_s5 = sand.u32 1, %s757_s17   ;;  %s527_s6 = sshll.u32 %s761_s18, 7 }
  0x2e   : > { %p887_p12 = por %p1018_p10, %p35_p1  ;;  %s526_s7 = sshll.u32 %s173_s5, 3 }
  0x2f   : > { %s896_s9 = scalar_lea.hbm %s1006_s0, %s527_s6  ;;  %s177_s25 = scalar_lea.vmem [#allocation2], %s526_s7 }
  0x30   : > { %s184_s28 = sshll.u32 %s177_s25, 4  ;;  %p898_p11 = pnand %p586_p6, %p37_p8  ;;  %s902_s28 = int_to_ptr.vmem [resolvable:$true] %s184_s28 }
  0x31   : > { %s174_s10 = scalar_lea.sflag [#allocation3], %s173_s5  ;;  %s661_s11 = scalar_lea.hbm %s896_s9, 128 }
  0x32   : > { %p662_p13 = scmp.ne.s32.totalorder %s896_s9, %s661_s11  ;;  %p663_p0 = pneg %p898_p11 }
  0x33   : > { %s666_s14 = scalar_lea.hbm %s1006_s0, 256  ;;  %p667_p7 = scmp.lt.u32.totalorder %s896_s9, %s1006_s0 }
  0x34   : > { %p664_p3 = pnand %p663_p0, %p662_p13  ;;  %p668_p9 = scmp.lt.u32.totalorder %s666_s14, %s661_s11 }
  0x35   : > { %p670_p1 = scmp.lt.u32.totalorder %s661_s11, %s896_s9 }
  0x36   : > { %p665_p5 = pneg %p664_p3  ;;  %p669_p2 = por %p668_p9, %p667_p7 }
  0x38   : > { %p671_p4 = por %p670_p1, %p669_p2 }
  0x3a   : > { %p672_p6 = pnand %p671_p4, %p665_p5 }
  0x3c   : > { %675 = shalt.err (!%p672_p6)
}
  0x3d   : > { %s676_s5 = scalar_lea.vmem %s902_s28, 128  ;;  %s766_s7 = smov [#allocation2]  }
  0x3e   : > { %p677_p8 = scmp.ne.s32.totalorder %s902_s28, %s676_s5  ;;  %s681_s26 = sshll.u32 %s766_s7, 4  ;;  %s682_s26 = int_to_ptr.vmem [resolvable:$false] %s681_s26 }
  0x3f   : > { %s683_s8 = scalar_lea.vmem %s682_s26, 256  ;;  %p684_p3 = scmp.lt.s32.totalorder %s902_s28, %s682_s26 }
  0x40   : > { %p679_p10 = pnand %p677_p8, %p663_p0  ;;  %p685_p7 = scmp.lt.s32.totalorder %s683_s8, %s676_s5 }
  0x42   : > { %p680_p13 = pneg %p679_p10  ;;  %p686_p9 = por %p685_p7, %p684_p3 }
  0x44   : > { %p687_p2 = pnand %p686_p9, %p680_p13 }
  0x46   : > { %690 = shalt.err (!%p687_p2)
}
  0x47   : > { %580 = dma.hbm_to_vmem [thread:$0]  (!%p898_p11), %s896_s9, 128, %s902_s28, %s174_s10  }
  0x48   : > { %p1021_p5 = scmp.ne.s32.totalorder %s1016_s23, 0 }
  0x49   : > { %s932_s25 = sand.u32 (!%p1021_p5), 1, %s753_s16   ;;  %p1022_p0 = scmp.ne.s32.totalorder (!%p1021_p5), %s1014_s21, 0 }
  0x4a   : > { %193 = sbr.rel (%p1021_p5) target bundleno = 1079 (0x437), region = 36  ;;  %s529_s11 = sshll.u32 (!%p1021_p5), %s932_s25, 3 }
  0x4b   : > { %s196_s12 = scalar_lea.sflag (!%p1021_p5), [#allocation3], %s932_s25  ;;  %s199_s13 = scalar_lea.vmem (!%p1021_p5), [#allocation2], %s529_s11 }
  0x51   : > { %736 = dma.done.wait (%p1022_p0), %s196_s12, 128  }
  0x52   : > { %738 = vsyncadd (%p1022_p0), %s196_s12, 4294967168  ;;  %p1023_p1 = scmp.eq.s32.totalorder %s817_s19, 0 }
  0x54   : > { %740 = dma.done.wait (%p1023_p1), [#allocation6], 512   ;;  %p1024_p11 = pmov %p1023_p1 }
  0x55   : > { %v767_v0 = vmov 0.0   ;;  %vm768_vm0 = vmmov 0   ;;  %v230_v1 = vld [vmem:[#allocation5] sm:$0xff]  ;;  %v231_v2 = vld [vmem:[#allocation5 + $0x8] sm:$0xff]  ;;  %v232_v3 = vld [vmem:[#allocation5 + $0x10] sm:$0xff]  ;;  %vm243_vm1 = vcmask 261120  }
  0x56   : > { %742 = vsyncadd (%p1024_p11), [#allocation6], 4294966784  ;;  %546 = vmatprep.subr.bf16.mxu0 %v767_v0  ;;  %550 = vmatprep.mubr.msk.bf16.mxu0 %vm768_vm0, %v767_v0  ;;  %v234_v4 = vpack.c.bf16 %v231_v2, %v230_v1  ;;  %v233_v5 = vld [vmem:[#allocation5 + $0x18] sm:$0xff]  ;;  %v531_v9 = vld [vmem:[%s1008_s2] ss:$0 sm:$0xff]  ;;  %vm365_vm2 = vcmask 57344  }
  0x57   : > { %554 = vmatprep.subr.mxu1 %v767_v0  ;;  %556 = vmatprep.mubr.msk.f32.mxu1 %vm768_vm0, %v767_v0  ;;  %v235_v6 = vpack.c.bf16 %v233_v5, %v232_v3  ;;  %v228_v7 = vld [vmem:[%s199_s13] sm:$0xff]  ;;  %vm382_vm3 = vcmask 1043456   ;;  %vm378_vm4 = vcmask 64512   ;;  %s769_s29 = smov 32   ;;  %s536_s10 = sshll.u32 %s817_s19, 4  ;;  %vm430_vm5 = vcmask 326656  }
  0x58   : > { %547 = vmatpush3.bf16.msra.mxu0 %v234_v4  ;;  %v229_v8 = vpack.c.bf16 %v228_v7, %v228_v7  ;;  %v288_v16 = vld [vmem:[%s1009_s3] sm:$0x1]  ;;  %s226_s14 = scalar_lea.vmem [#allocation7], %s932_s25  ;;  %s962_s7 = scalar_lea.hbm %s1010_s4, %s536_s10 }
  0x59   : > { %548 = vmatprep.subr.bf16.mxu0 %v767_v0  ;;  %s446_s20 = sshll.u32 %s226_s14, 4  ;;  %s434_s19 = scalar_lea.sflag [#allocation4], %s932_s25  ;;  %s964_s20 = int_to_ptr.vmem [resolvable:$true] %s446_s20 }
  0x5a   : > { %v383_v25 = vsel %vm382_vm3, %v229_v8, 0  ;;  %s691_s26 = scalar_lea.vmem %s964_s20, 16  ;;  %s770_s8 = smov [#allocation7]  }
  0x5b   : > { %p692_p4 = scmp.ne.s32.totalorder %s964_s20, %s691_s26  ;;  %s695_s11 = sshll.u32 %s770_s8, 4  ;;  %s696_s11 = int_to_ptr.vmem [resolvable:$false] %s695_s11 }
  0x5c   : > { %549 = vmatpush3.bf16.msra.mxu0 %v235_v6  ;;  %s697_s12 = scalar_lea.vmem %s696_s11, 32  ;;  %p698_p10 = scmp.lt.s32.totalorder %s964_s20, %s696_s11 }
  0x5d   : > { %p693_p6 = pnand %p692_p4, %p887_p12  ;;  %p699_p13 = scmp.lt.s32.totalorder %s697_s12, %s691_s26 }
  0x5f   : > { %551 = vmatmul.mubr.msk.bf16.vlgmr.msra.gmra.mrb[0].mxu0 %vm243_vm1, %v229_v8  ;;  %p694_p8 = pneg %p693_p6  ;;  %p700_p3 = por %p699_p13, %p698_p10 }
  0x61   : > { %p701_p7 = pnand %p700_p3, %p694_p8 }
 0x132   : > { %v281_v10 = vpop.f32.mrb[0].mxu0 }
 0x133   : > { %v282_v11 = vadd.f32 %v531_v9, %v281_v10  ;;  %v552_v12 = vpop.f32.mrb[1].mxu0 }
 0x134   : > { %v284_v13 = vpop.f32.mrb[2].mxu0 }
 0x135   : > { %627 = vtanh.f32 %v282_v11  ;;  %v553_v14 = vpop.f32.mrb[3].mxu0 }
 0x13f   : > { %v628_v15 = vpop.eup %627 }
 0x140   : > { %555 = vmatpush3.xpose.msk.msra.mxu1 %vm243_vm1, %v628_v15 }
 0x141   : > { %559 = vmatprep.subr.bf16.mxu1 %v767_v0 }
 0x143   : > { %557 = vmatmul.mubr.msk.f32.vlgmr.msra.gmra.mrb[0].mxu1 %vm243_vm1, %v288_v16 }
 0x144   : > { %561 = vmatprep.mubr.msk.bf16.mxu1 %vm768_vm0, %v767_v0  ;;  %560 = vmatpush3.bf16.msra.mxu1 %v383_v25 }
 0x216   : > { %v361_v17 = vpop.f32.mrb[0].mxu1 }
 0x217   : > { %v558_v18 = vpop.f32.mrb[1].mxu1  ;;  %v366_v19 = vsel %vm365_vm2, %v361_v17, -inf }
 0x218   : > { %367 = vmax.xlane.f32.xlu0 %v366_v19 }
 0x2a5   : > { %v368_v20 = vpop.xlane.xlu0 %367 }
 0x2a6   : > { %v369_v21 = vsub.f32 %v361_v17, %v368_v20 }
 0x2a8   : > { %v370_v22 = vmul.f32 1.442695, %v369_v21 }
 0x2aa   : > { %629 = vpow2.f32 %v370_v22 }
 0x2b4   : > { %v630_v23 = vpop.eup %629 }
 0x2b5   : > { %v372_v24 = vsel %vm365_vm2, %v630_v23, 0.0 }
 0x2b6   : > { %373 = vadd.xlane.f32.xlu0 %v372_v24 }
 0x343   : > { %v374_v26 = vpop.xlane.xlu0 %373 }
 0x344   : > { %631 = vrcp.f32 %v374_v26 }
 0x34e   : > { %v632_v27 = vpop.eup %631 }
 0x34f   : > { %v376_v28 = vmul.f32 %v632_v27, %v630_v23 }
 0x351   : > { %426 = vrot.lane.b32.xlu1 %v376_v28, %s769_s29  ;;  %v377_v29 = vpack.c.bf16 %v376_v28, %v376_v28 }
 0x353   : > { %562 = vmatmul.mubr.msk.bf16.vlgmr.msra.gmra.mrb[4].mxu1 %vm378_vm4, %v377_v29 }
 0x3c3   : > { %v427_v30 = vpop.permute.xlu1 %426 }
 0x426   : > { %v419_v31 = vpop.f32.mrb[4].mxu1 }
 0x427   : > { %v429_v32 = vsel %vm243_vm1, %v419_v31, %v427_v30  ;;  %v563_v33 = vpop.f32.mrb[5].mxu1 }
 0x428   : > { %v431_v34 = vsel %vm430_vm5, %v429_v32, 0.0  ;;  %v422_v35 = vpop.f32.mrb[6].mxu1 }
 0x429   : > { %432 = vst [vmem:[%s226_s14] sm:$0x1] %v431_v34  ;;  %v564_v36 = vpop.f32.mrb[7].mxu1 }
 0x42a   : > { %704 = shalt.err (!%p701_p7)
}
 0x42b   : > { %s705_s25 = scalar_lea.hbm %s962_s7, 16  ;;  %s709_s23 = scalar_lea.hbm %s1010_s4, 32 }
 0x42c   : > { %p706_p9 = scmp.ne.s32.totalorder %s962_s7, %s705_s25  ;;  %p710_p0 = scmp.lt.u32.totalorder %s962_s7, %s1010_s4 }
 0x42d   : > { %p711_p1 = scmp.lt.u32.totalorder %s709_s23, %s705_s25  ;;  %p713_p4 = scmp.lt.u32.totalorder %s705_s25, %s962_s7 }
 0x42e   : > { %p707_p2 = pnand %p706_p9, %p887_p12 }
 0x42f   : > { %p712_p11 = por %p711_p1, %p710_p0 }
 0x430   : > { %p708_p5 = pneg %p707_p2 }
 0x431   : > { %p714_p6 = por %p713_p4, %p712_p11 }
 0x433   : > { %p715_p8 = pnand %p714_p6, %p708_p5 }
 0x435   : > { %718 = shalt.err (!%p715_p8)
}
 0x436   : > { %571 = dma.vmem_to_hbm [thread:$0]  (%p887_p12), %s964_s20, 16, %s962_s7, %s434_s19  }
 0x437 PF: > { %s458_s29 = sand.u32 1, %s749_s15   ;;  %p1025_p10 = scmp.ne.s32.totalorder %s1015_s22, 0 }
 0x438   : > { %p1026_p13 = scmp.ge.s32.totalorder %s761_s18, 2  ;;  %s459_s10 = scalar_lea.sflag [#allocation4], %s458_s29 }
 0x43a   : > { %p582_p3 = pnand %p1026_p13, %p1025_p10 }
 0x43c   : > { %744 = dma.done.wait (!%p582_p3), %s459_s10, 16  }
 0x43d   : > { %746 = vsyncadd (!%p582_p3), %s459_s10, 4294967280  ;;  %p18_p7 = scmp.ge.s32.totalorder %s852_s27, 4   ;;  %s1027_s15 = smov %s753_s16 }
 0x43e   : > { %s1028_s16 = smov %s757_s17  ;;  %s1029_s17 = smov %s883_s24 }
 0x43f   : > { %s1030_s18 = smov %s852_s27  ;;  %20 = sbr.rel (!%p18_p7) target bundleno = 6 (0x6), region = 85 }
 0x446   :  { %463 = vsyncpa [#allocation3], 1 }
 0x447   :  { %465 = vsyncpa [#allocation3 + $0x1], 1 }
 0x448   :  { %466 = vsyncpa [#allocation6], 1 }
 0x449   :  { %467 = vsyncpa [#allocation4], 1 }
 0x44a   :  { %469 = vsyncpa [#allocation4 + $0x1], 1 }

</bundles_post_ra>
